<compile_context>
chip_gen: v7x
topology: tpu7x:2x2x1
jax: 0.10.0
libtpu: 0.0.40
codegen_flags: <defaults>
</compile_context>

<pallas_src>
import jax
import jax.numpy as jnp
from jax import lax
from jax.experimental import pallas as pl
from jax.experimental.pallas import tpu as pltpu

BN_EPS = 1e-5
LANE = 128


def _round_up(x, m):
    return ((x + m - 1) // m) * m


def _sublane_pack(dtype):
    """Sublane packing multiple: 8 rows for 4-byte, 16 for 2-byte, 32 for 1-byte."""
    return 8 * max(1, 4 // jnp.dtype(dtype).itemsize)


def _vmem_budget_bytes(headroom_bytes=16 << 20):
    """Generation-aware VMEM budget (physical capacity minus headroom)."""
    try:
        cap = int(pltpu.get_tpu_info().vmem_capacity_bytes)
    except Exception:
        cap = 64 << 20  # conservative fallback (v7x per-core VMEM)
    return max(cap - headroom_bytes, 16 << 20)


def _resident_spec(shape, index_map):
    """BlockSpec for a VMEM-resident constant operand (block index never
    changes): request single-buffering to halve its VMEM footprint."""
    try:
        return pl.BlockSpec(shape, index_map, pipeline_mode=pl.Buffered(1))
    except Exception:  # older jax without pipeline_mode on BlockSpec
        return pl.BlockSpec(shape, index_map)


# ---------------------------------------------------------------------------
# Kernels
# ---------------------------------------------------------------------------

def _stats_kernel(x_ref, w1t_ref, h_ref, stats_ref):
    """Pass 1: h = x @ W1^T (native-dtype MXU, f32 accumulation); emit h and
    this batch tile's per-feature [sum; sum_sq] partial (single store)."""
    h = jnp.dot(x_ref[...], w1t_ref[...], preferred_element_type=jnp.float32)
    h_ref[...] = h.astype(h_ref.dtype)
    s = jnp.sum(h, axis=0, keepdims=True)        # (1, hid_p)
    sq = jnp.sum(h * h, axis=0, keepdims=True)   # (1, hid_p)
    stats_ref[...] = jnp.concatenate([s, sq], axis=0)[None]   # (1, 2, hid_p)


def _apply_kernel(h_ref, scale_ref, shift_ref, w2t_ref, b2_ref, o_ref):
    """Pass 2: out = relu(h * scale + shift) @ W2^T + b2."""
    h = h_ref[...].astype(jnp.float32)
    hn = jnp.maximum(h * scale_ref[...] + shift_ref[...], 0.0)   # f32 VPU math
    out = jnp.dot(hn.astype(w2t_ref.dtype), w2t_ref[...],
                  preferred_element_type=jnp.float32)
    o_ref[...] = (out + b2_ref[...]).astype(o_ref.dtype)


# ---------------------------------------------------------------------------
# Parameter prep (one time, outside the hot path)
# ---------------------------------------------------------------------------

def prepare_params(w1, gamma, beta, w2, b2, *, param_dtype=None):
    """Optional cast (e.g. bf16), pre-transpose to [in, out] layout, zero-pad
    feature dims to multiples of 128 so every kernel matmul is plain row-major
    x @ W with lane-dense tiles.

    Zero padding is exact: padded hidden columns get gamma=0/beta=0 so BN maps
    them to 0, and padded output columns are sliced off in the wrapper.
    """
    hidden, in_dim = w1.shape
    out_dim, hidden2 = w2.shape
    assert hidden2 == hidden and gamma.shape == (hidden,) and b2.shape == (out_dim,)

    if param_dtype is not None:
        w1 = w1.astype(param_dtype)
        w2 = w2.astype(param_dtype)

    in_p = _round_up(in_dim, LANE)
    hid_p = _round_up(hidden, LANE)
    out_p = _round_up(out_dim, LANE)

    w1t = jnp.zeros((in_p, hid_p), w1.dtype).at[:in_dim, :hidden].set(w1.T)
    w2t = jnp.zeros((hid_p, out_p), w2.dtype).at[:hidden, :out_dim].set(w2.T)
    gamma_p = jnp.zeros((1, hid_p), jnp.float32).at[0, :hidden].set(gamma.astype(jnp.float32))
    beta_p = jnp.zeros((1, hid_p), jnp.float32).at[0, :hidden].set(beta.astype(jnp.float32))
    b2_p = jnp.zeros((1, out_p), jnp.float32).at[0, :out_dim].set(b2.astype(jnp.float32))

    return dict(w1t=w1t, gamma=gamma_p, beta=beta_p, w2t=w2t, b2=b2_p,
                in_dim=in_dim, hidden=hidden, out_dim=out_dim)


# ---------------------------------------------------------------------------
# Forward wrapper
# ---------------------------------------------------------------------------

def projection_head(x, params, *, batch_tile=512):
    """x: [bsz, in_dim]; params from prepare_params(). Returns [bsz, out_dim]."""
    bsz, in_dim = x.shape
    assert in_dim == params["in_dim"]
    w1t, w2t = params["w1t"], params["w2t"]
    in_p, hid_p = w1t.shape
    out_p = w2t.shape[1]
    out_dim = params["out_dim"]

    h_dtype = x.dtype            # keep h at activation precision for the round-trip
    x_isz = jnp.dtype(x.dtype).itemsize
    h_isz = jnp.dtype(h_dtype).itemsize
    o_isz = x_isz
    w_isz = jnp.dtype(w1t.dtype).itemsize

    # ---- batch-tile sizing against a generation-aware VMEM budget ----------
    pack = _sublane_pack(x.dtype)
    budget = _vmem_budget_bytes()
    resident = (in_p * hid_p + hid_p * out_p) * w_isz + 16 * hid_p * 4 + 8 * out_p * 4
    per_row = max(2 * (in_p * x_isz + hid_p * h_isz),    # pass 1: x in, h out (double-buffered)
                  2 * (hid_p * h_isz + out_p * o_isz))   # pass 2: h in, out out
    avail = budget - resident - (4 << 20)
    fit = max(pack, (avail // per_row) // pack * pack) if avail > 0 else pack
    tile_b = int(max(pack, min(_round_up(min(batch_tile, bsz), pack), fit)))

    bsz_p = _round_up(bsz, tile_b)
    nb = bsz_p // tile_b

    if (bsz_p, in_p) != (bsz, in_dim):
        # Zero rows/cols are exact: they add 0 to the BN sums (we divide by the
        # real batch size) and padded output rows/cols are sliced off below.
        x_p = jnp.zeros((bsz_p, in_p), x.dtype).at[:bsz, :in_dim].set(x)
    else:
        x_p = x

    cparams = pltpu.CompilerParams(dimension_semantics=("parallel",),
                                   vmem_limit_bytes=int(budget))

    # ---- pass 1: h = x @ W1^T and per-tile BN partial sums ------------------
    stats_cost = pl.CostEstimate(
        flops=2 * bsz_p * in_p * hid_p, transcendentals=0,
        bytes_accessed=(x_p.size * x_isz + in_p * hid_p * w_isz
                        + bsz_p * hid_p * h_isz + nb * 2 * hid_p * 4))

    h_pad, partial = pl.pallas_call(
        _stats_kernel,
        out_shape=(jax.ShapeDtypeStruct((bsz_p, hid_p), h_dtype),
                   jax.ShapeDtypeStruct((nb, 2, hid_p), jnp.float32)),
        grid_spec=pltpu.PrefetchScalarGridSpec(
            num_scalar_prefetch=0,
            grid=(nb,),
            in_specs=[
                pl.BlockSpec((tile_b, in_p), lambda i: (i, 0)),       # x tile
                _resident_spec((in_p, hid_p), lambda i: (0, 0)),      # W1^T (VMEM-resident)
            ],
            out_specs=(
                pl.BlockSpec((tile_b, hid_p), lambda i: (i, 0)),      # h tile
                pl.BlockSpec((1, 2, hid_p), lambda i: (i, 0, 0)),     # partial [sum; sumsq]
            ),
        ),
        compiler_params=cparams,
        cost_estimate=stats_cost,
    )(x_p, w1t)

    # ---- BN fold in the wrapper (hid_p elements of plain XLA) ---------------
    sums = jnp.sum(partial, axis=0)                              # (2, hid_p) f32
    inv_n = jnp.float32(1.0 / bsz)
    mean = sums[0:1] * inv_n                                     # (1, hid_p)
    var = jnp.maximum(sums[1:2] * inv_n - mean * mean, 0.0)      # guard cancellation
    scale = params["gamma"] * lax.rsqrt(var + BN_EPS)            # (1, hid_p) f32
    shift = params["beta"] - mean * scale                        # (1, hid_p) f32

    # ---- pass 2: out = relu(h * scale + shift) @ W2^T + b2 ------------------
    apply_cost = pl.CostEstimate(
        flops=2 * bsz_p * hid_p * out_p, transcendentals=0,
        bytes_accessed=(bsz_p * hid_p * h_isz + hid_p * out_p * w_isz
                        + bsz_p * out_p * o_isz + 3 * hid_p * 4 + out_p * 4))

    out_padded = pl.pallas_call(
        _apply_kernel,
        out_shape=jax.ShapeDtypeStruct((bsz_p, out_p), x.dtype),
        grid_spec=pltpu.PrefetchScalarGridSpec(
            num_scalar_prefetch=0,
            grid=(nb,),
            in_specs=[
                pl.BlockSpec((tile_b, hid_p), lambda i: (i, 0)),      # h tile
                _resident_spec((1, hid_p), lambda i: (0, 0)),         # scale
                _resident_spec((1, hid_p), lambda i: (0, 0)),         # shift
                _resident_spec((hid_p, out_p), lambda i: (0, 0)),     # W2^T (VMEM-resident)
                _resident_spec((1, out_p), lambda i: (0, 0)),         # b2
            ],
            out_specs=pl.BlockSpec((tile_b, out_p), lambda i: (i, 0)),
        ),
        compiler_params=cparams,
        cost_estimate=apply_cost,
    )(h_pad, scale, shift, w2t, params["b2"])

    return out_padded[:bsz, :out_dim]


# ---------------------------------------------------------------------------
# Reference + test
# ---------------------------------------------------------------------------

def reference(x, w1, gamma, beta, w2, b2):
    h = x @ w1.T
    mean = h.mean(axis=0, keepdims=True)
    var = ((h - mean) ** 2).mean(axis=0, keepdims=True)
    h = (h - mean) / jnp.sqrt(var + BN_EPS)
    h = h * gamma + beta
    h = jnp.maximum(h, 0.0)
    return h @ w2.T + b2


if __name__ == "__main__":
    # Shapes analogous to ProjectionHead([(32, 32, BatchNorm1d(32), ReLU()),
    #                                     (32, 16, None, None)])
    bsz, in_dim, hidden, out_dim = 8, 32, 32, 16

    key = jax.random.PRNGKey(0)
    kx, kw1, kw2, kb2, kx2 = jax.random.split(key, 5)

    x = jax.random.normal(kx, (bsz, in_dim), dtype=jnp.float32)

    bound1 = 1.0 / jnp.sqrt(jnp.float32(in_dim))
    bound2 = 1.0 / jnp.sqrt(jnp.float32(hidden))
    w1 = jax.random.uniform(kw1, (hidden, in_dim), jnp.float32, -bound1, bound1)
    w2 = jax.random.uniform(kw2, (out_dim, hidden), jnp.float32, -bound2, bound2)
    b2 = jax.random.uniform(kb2, (out_dim,), jnp.float32, -bound2, bound2)
    gamma = jnp.ones((hidden,), jnp.float32)   # BatchNorm1d weight
    beta = jnp.zeros((hidden,), jnp.float32)   # BatchNorm1d bias

    # One-time parameter prep (transpose + lane padding), outside the hot path.
    params = prepare_params(w1, gamma, beta, w2, b2)

    out = projection_head(x, params)
    jax.block_until_ready(out)
    ref = reference(x, w1, gamma, beta, w2, b2)
    assert out.shape == (bsz, out_dim)
    assert jnp.allclose(out, ref, atol=1e-4, rtol=1e-4), "mismatch vs reference"

    # Multi-tile path (exercises the cross-tile partial-stats reduction).
    bsz2 = 40
    x2 = jax.random.normal(kx2, (bsz2, in_dim), dtype=jnp.float32)
    out2 = projection_head(x2, params, batch_tile=16)
    jax.block_until_ready(out2)
    ref2 = reference(x2, w1, gamma, beta, w2, b2)
    assert out2.shape == (bsz2, out_dim)
    assert jnp.allclose(out2, ref2, atol=1e-4, rtol=1e-4), "mismatch (multi-tile)"

    print("KERNEL_OK")
</pallas_src>

<mosaic_0001>
module attributes {stable_mosaic.version = 11 : i64} {
  func.func @_stats_kernel(%arg0: i32, %arg1: memref<8x128xf32, #tpu.memory_space<vmem>>, %arg2: memref<128x128xf32, #tpu.memory_space<vmem>>, %arg3: memref<8x128xf32, #tpu.memory_space<vmem>>, %arg4: memref<1x2x128xf32, #tpu.memory_space<vmem>>) attributes {dimension_semantics = [#tpu.dimension_semantics<parallel>], iteration_bounds = array<i64: 1>, scalar_prefetch = 0 : i64, scratch_operands = 0 : i64, tpu.core_type = #tpu.core_type<tc>, window_params = [{transform_indices = @transform_0, window_bounds = array<i64: 8, 128>}, {pipeline_mode = #tpu.pipeline_mode<synchronous>, transform_indices = @transform_1, window_bounds = array<i64: 128, 128>}, {transform_indices = @transform_2, window_bounds = array<i64: 8, 128>}, {transform_indices = @transform_3, window_bounds = array<i64: 1, 2, 128>}]} {
    %c0 = arith.constant 0 : index
    %c0_0 = arith.constant 0 : index
    %0 = vector.load %arg1[%c0, %c0_0] : memref<8x128xf32, #tpu.memory_space<vmem>>, vector<8x128xf32>
    %c0_1 = arith.constant 0 : index
    %c0_2 = arith.constant 0 : index
    %1 = vector.load %arg2[%c0_1, %c0_2] : memref<128x128xf32, #tpu.memory_space<vmem>>, vector<128x128xf32>
    %cst = arith.constant dense<0.000000e+00> : vector<8x128xf32>
    %2 = tpu.matmul %0, %1, %cst {dimension_numbers = #tpu.dot_dimension_numbers<[1], [0], [0], [1], [0, 0, 1, 1], [], []>} : vector<8x128xf32>, vector<128x128xf32>, vector<8x128xf32> -> vector<8x128xf32>
    %c0_3 = arith.constant 0 : index
    %c0_4 = arith.constant 0 : index
    %3 = vector.load %arg3[%c0_3, %c0_4] : memref<8x128xf32, #tpu.memory_space<vmem>>, vector<8x128xf32>
    tpu.vector_store %arg3[%c0_3, %c0_4], %2 {strides = array<i32>} : memref<8x128xf32, #tpu.memory_space<vmem>>, vector<8x128xf32>,
    %cst_5 = arith.constant dense<0.000000e+00> : vector<128xf32>
    %4 = vector.multi_reduction <add>, %2, %cst_5 [0] : vector<8x128xf32> to vector<128xf32>
    %5 = vector.shape_cast %4 : vector<128xf32> to vector<1x128xf32>
    %6 = arith.mulf %2, %2 : vector<8x128xf32>
    %cst_6 = arith.constant dense<0.000000e+00> : vector<128xf32>
    %7 = vector.multi_reduction <add>, %6, %cst_6 [0] : vector<8x128xf32> to vector<128xf32>
    %8 = vector.shape_cast %7 : vector<128xf32> to vector<1x128xf32>
    %9 = tpu.concatenate %5, %8 in 0 : vector<1x128xf32>, vector<1x128xf32> -> vector<2x128xf32>
    %10 = vector.shape_cast %9 : vector<2x128xf32> to vector<1x2x128xf32>
    %c0_7 = arith.constant 0 : index
    %c0_8 = arith.constant 0 : index
    %c0_9 = arith.constant 0 : index
    %11 = vector.load %arg4[%c0_7, %c0_8, %c0_9] : memref<1x2x128xf32, #tpu.memory_space<vmem>>, vector<1x2x128xf32>
    tpu.vector_store %arg4[%c0_7, %c0_8, %c0_9], %10 {strides = array<i32>} : memref<1x2x128xf32, #tpu.memory_space<vmem>>, vector<1x2x128xf32>,
    return
  }
  func.func @transform_0(%arg0: i32) -> (i32, i32) {
    %c0_i32 = arith.constant 0 : i32
    %c0_i32_0 = arith.constant 0 : i32
    return %arg0, %c0_i32 : i32, i32
  }
  func.func @transform_1(%arg0: i32) -> (i32, i32) {
    %c0_i32 = arith.constant 0 : i32
    %c0_i32_0 = arith.constant 0 : i32
    %c0_i32_1 = arith.constant 0 : i32
    return %c0_i32, %c0_i32_0 : i32, i32
  }
  func.func @transform_2(%arg0: i32) -> (i32, i32) {
    %c0_i32 = arith.constant 0 : i32
    %c0_i32_0 = arith.constant 0 : i32
    return %arg0, %c0_i32 : i32, i32
  }
  func.func @transform_3(%arg0: i32) -> (i32, i32, i32) {
    %c0_i32 = arith.constant 0 : i32
    %c0_i32_0 = arith.constant 0 : i32
    %c0_i32_1 = arith.constant 0 : i32
    return %arg0, %c0_i32, %c0_i32_0 : i32, i32, i32
  }
}

</mosaic_0001>

<bundles_post_ra>
// kernel: tpu_custom_call.1
= control target key start
LH: loop header
LB: loop body
LE: loop exit
PB: predicated region body
PF: predicated region fallthrough
CT: control target
= control target key end

     0   :  { %9 = vsyncpa [#allocation3], 0  ;;  %s440_s0 = inlined_call_operand.hbm [shape: f32[8,128], index: 0, kind: input, shape index: {}]   ;;  %s441_s1 = inlined_call_operand.hbm [shape: f32[128,128], index: 1, kind: input, shape index: {}]   ;;  %s442_s2 = inlined_call_operand.hbm [shape: f32[8,128], index: 2, kind: output, shape index: {0}]   ;;  %s443_s3 = inlined_call_operand.hbm [shape: f32[1,2,128], index: 3, kind: output, shape index: {1}]  }
   0x1   :  { %10 = vsyncpa [#allocation6], 0 }
   0x2   :  { %11 = vsyncpa [#allocation4], 0 }
   0x3   :  { %12 = vsyncpa [#allocation9], 0  ;;  %s356_s12 = smov [#allocation2]   ;;  %s357_s14 = smov [#allocation5]  }
   0x4   :  { %s19_s13 = sshll.u32 %s356_s12, 4  ;;  %s28_s15 = sshll.u32 %s357_s14, 4  ;;  %s20_s13 = int_to_ptr.vmem [resolvable:$true] %s19_s13  ;;  %s385_s15 = int_to_ptr.vmem [resolvable:$true] %s28_s15 }
   0x5   :  { %s260_s18 = scalar_lea.hbm %s440_s0, 128 }
   0x6   :  { %p261_p0 = scmp.ne.s32.totalorder %s440_s0, %s260_s18  ;;  %p264_p1 = scmp.lt.u32.totalorder %s260_s18, %s440_s0 }
   0x8   :  { %p266_p2 = pnand %p264_p1, %p261_p0 }
   0xa   :  { %269 = shalt.err (!%p266_p2)
}
   0xb   :  { %s270_s23 = scalar_lea.vmem %s20_s13, 128  ;;  %p275_p4 = scmp.lt.s32.totalorder %s20_s13, %s20_s13 }
   0xc   :  { %p271_p3 = scmp.ne.s32.totalorder %s20_s13, %s270_s23  ;;  %p276_p5 = scmp.lt.s32.totalorder %s270_s23, %s270_s23 }
   0xe   :  { %p277_p6 = por %p276_p5, %p275_p4 }
  0x10   :  { %p278_p7 = pnand %p277_p6, %p271_p3 }
  0x12   :  { %281 = shalt.err (!%p278_p7)
}
  0x13   :  { %22 = dma.hbm_to_vmem [thread:$0]  %s440_s0, 128, %s20_s13, [#allocation3]  }
  0x14   :  { %s282_s28 = scalar_lea.hbm %s441_s1, 2048 }
  0x15   :  { %p283_p8 = scmp.ne.s32.totalorder %s441_s1, %s282_s28  ;;  %p286_p9 = scmp.lt.u32.totalorder %s282_s28, %s441_s1 }
  0x17   :  { %p288_p10 = pnand %p286_p9, %p283_p8 }
  0x19   :  { %291 = shalt.err (!%p288_p10)
}
  0x1a   :  { %s292_s6 = scalar_lea.vmem %s385_s15, 2048  ;;  %p297_p12 = scmp.lt.s32.totalorder %s385_s15, %s385_s15 }
  0x1b   :  { %p293_p11 = scmp.ne.s32.totalorder %s385_s15, %s292_s6  ;;  %p298_p13 = scmp.lt.s32.totalorder %s292_s6, %s292_s6 }
  0x1d   :  { %p299_p0 = por %p298_p13, %p297_p12 }
  0x1f   :  { %p300_p1 = pnand %p299_p0, %p293_p11 }
  0x21   :  { %303 = shalt.err (!%p300_p1)
}
  0x22   :  { %s358_s0 = smov 128   ;;  %s359_s7 = smov 8  }
  0x23   :  { %34 = dma.hbm_to_vmem [thread:$0]  %s441_s1, 2048, %s385_s15, [#allocation6], %s358_s0, %s358_s0, %s359_s7  }
  0x24   :  { %348 = dma.done.wait [#allocation3], 128  }
  0x25   :  { %349 = vsyncadd [#allocation3], 4294967168 }
  0x26   :  { %350 = dma.done.wait [#allocation6], 2048  }
  0x27   :  { %351 = vsyncadd [#allocation6], 4294965248  ;;  %v360_v0 = vmov 0.0|0.0   ;;  %vm361_vm0 = vmmov 0   ;;  %v362_v1 = vmov 0.0   ;;  %v42_v2 = vld [vmem:[#allocation5] sm:$0xff] }
  0x28   :  { %227 = vmatprep.subr.bf16.mxu0 %v360_v0  ;;  %224 = vmatprep.mubr.msk.f32.mxu0 %vm361_vm0, %v362_v1  ;;  %v43_v3 = vld [vmem:[#allocation5 + $0x8] sm:$0xff]  ;;  %v44_v4 = vld [vmem:[#allocation5 + $0x10] sm:$0xff]  ;;  %v45_v6 = vld [vmem:[#allocation5 + $0x18] sm:$0xff]  ;;  %s363_s1 = smov [#allocation7]  }
  0x29   :  { %v228_v5 = vpack.c.bf16 %v43_v3, %v42_v2  ;;  %v231_v7 = vpack.c.bf16 %v45_v6, %v44_v4  ;;  %v46_v8 = vld [vmem:[#allocation5 + $0x20] sm:$0xff]  ;;  %v47_v9 = vld [vmem:[#allocation5 + $0x28] sm:$0xff]  ;;  %v48_v11 = vld [vmem:[#allocation5 + $0x30] sm:$0xff]  ;;  %s151_s10 = sshll.u32 %s363_s1, 4  ;;  %s152_s10 = int_to_ptr.vmem [resolvable:$true] %s151_s10 }
  0x2a   :  { %v234_v10 = vpack.c.bf16 %v47_v9, %v46_v8  ;;  %v49_v12 = vld [vmem:[#allocation5 + $0x38] sm:$0xff]  ;;  %v50_v14 = vld [vmem:[#allocation5 + $0x40] sm:$0xff]  ;;  %v51_v15 = vld [vmem:[#allocation5 + $0x48] sm:$0xff]  ;;  %s304_s11 = scalar_lea.vmem %s152_s10, 128  ;;  %p309_p3 = scmp.lt.s32.totalorder %s152_s10, %s152_s10 }
  0x2b   :  { %229 = vmatpush3.bf16.msra.mxu0 %v228_v5  ;;  %v237_v13 = vpack.c.bf16 %v49_v12, %v48_v11  ;;  %v240_v16 = vpack.c.bf16 %v51_v15, %v50_v14  ;;  %v52_v17 = vld [vmem:[#allocation5 + $0x50] sm:$0xff]  ;;  %v53_v18 = vld [vmem:[#allocation5 + $0x58] sm:$0xff]  ;;  %v54_v20 = vld [vmem:[#allocation5 + $0x60] sm:$0xff]  ;;  %p305_p2 = scmp.ne.s32.totalorder %s152_s10, %s304_s11  ;;  %p310_p4 = scmp.lt.s32.totalorder %s304_s11, %s304_s11 }
  0x2c   :  { %230 = vmatprep.subr.bf16.mxu0 %v360_v0  ;;  %v243_v19 = vpack.c.bf16 %v53_v18, %v52_v17  ;;  %v55_v21 = vld [vmem:[#allocation5 + $0x68] sm:$0xff]  ;;  %v56_v23 = vld [vmem:[#allocation5 + $0x70] sm:$0xff]  ;;  %v57_v24 = vld [vmem:[#allocation5 + $0x78] sm:$0xff] }
  0x2d   :  { %v246_v22 = vpack.c.bf16 %v55_v21, %v54_v20  ;;  %v249_v25 = vpack.c.bf16 %v57_v24, %v56_v23  ;;  %v41_v26 = vld [vmem:[#allocation2] sm:$0xff]  ;;  %p311_p5 = por %p310_p4, %p309_p3 }
  0x2f   :  { %232 = vmatpush3.bf16.msra.mxu0 %v231_v7  ;;  %p312_p6 = pnand %p311_p5, %p305_p2 }
  0x30   :  { %233 = vmatprep.subr.bf16.mxu0 %v360_v0 }
  0x33   :  { %235 = vmatpush3.bf16.msra.mxu0 %v234_v10 }
  0x34   :  { %236 = vmatprep.subr.bf16.mxu0 %v360_v0 }
  0x37   :  { %238 = vmatpush3.bf16.msra.mxu0 %v237_v13 }
  0x38   :  { %239 = vmatprep.subr.bf16.mxu0 %v360_v0 }
  0x3b   :  { %241 = vmatpush3.bf16.msra.mxu0 %v240_v16 }
  0x3c   :  { %242 = vmatprep.subr.bf16.mxu0 %v360_v0 }
  0x3f   :  { %244 = vmatpush3.bf16.msra.mxu0 %v243_v19 }
  0x40   :  { %245 = vmatprep.subr.bf16.mxu0 %v360_v0 }
  0x43   :  { %247 = vmatpush3.bf16.msra.mxu0 %v246_v22 }
  0x44   :  { %248 = vmatprep.subr.bf16.mxu0 %v360_v0 }
  0x47   :  { %250 = vmatpush3.bf16.msra.mxu0 %v249_v25 }
  0x4a   :  { %225 = vmatmul.mubr.f32.vlgmr.msra.gmra.mrb[0].mxu0 %v41_v26 }
 0x11d   :  { %v124_v27 = vpop.f32.mrb[0].mxu0 }
 0x11e   :  { %v129_v28 = vrot.slane %v124_v27, 4  ;;  %v135_v29 = vmul.f32 %v124_v27, %v124_v27  ;;  %128 = vst [vmem:[#allocation7] sm:$0xff] %v124_v27  ;;  %v226_v30 = vpop.f32.mrb[1].mxu0 }
 0x11f   :  { %315 = shalt.err (!%p312_p6)
}
 0x120   :  { %s316_s14 = scalar_lea.hbm %s442_s2, 128 }
 0x121   :  { %p317_p7 = scmp.ne.s32.totalorder %s442_s2, %s316_s14  ;;  %p320_p8 = scmp.lt.u32.totalorder %s316_s14, %s442_s2 }
 0x123   :  { %p322_p9 = pnand %p320_p8, %p317_p7 }
 0x125   :  { %325 = shalt.err (!%p322_p9)
}
 0x126   :  { %154 = dma.vmem_to_hbm [thread:$0]  %s152_s10, 128, %s442_s2, [#allocation4]   ;;  %v130_v31 = vadd.f32 %v129_v28, %v124_v27  ;;  %v136_v32 = vrot.slane %v135_v29, 4  ;;  %vm142_vm1 = vcmask 1040384  }
 0x127   :  { %s364_s21 = smov [#allocation8]  }
 0x128   :  { %v131_v33 = vrot.slane %v130_v31, 2  ;;  %v137_v34 = vadd.f32 %v136_v32, %v135_v29  ;;  %s161_s22 = sshll.u32 %s364_s21, 4  ;;  %s162_s22 = int_to_ptr.vmem [resolvable:$true] %s161_s22 }
 0x129   :  { %s326_s23 = scalar_lea.vmem %s162_s22, 32  ;;  %p331_p11 = scmp.lt.s32.totalorder %s162_s22, %s162_s22 }
 0x12a   :  { %v132_v35 = vadd.f32 %v131_v33, %v130_v31  ;;  %v138_v36 = vrot.slane %v137_v34, 2  ;;  %p327_p10 = scmp.ne.s32.totalorder %s162_s22, %s326_s23  ;;  %p332_p12 = scmp.lt.s32.totalorder %s326_s23, %s326_s23 }
 0x12c   :  { %v133_v37 = vrot.slane %v132_v35, 1  ;;  %v139_v38 = vadd.f32 %v138_v36, %v137_v34  ;;  %p333_p13 = por %p332_p12, %p331_p11 }
 0x12e   :  { %v140_v39 = vrot.slane %v139_v38, 1  ;;  %v134_v40 = vadd.f32 %v133_v37, %v132_v35  ;;  %p334_p0 = pnand %p333_p13, %p327_p10 }
 0x130   :  { %v141_v41 = vadd.f32 %v140_v39, %v139_v38 }
 0x132   :  { %v143_v42 = vsel %vm142_vm1, %v134_v40, %v141_v41 }
 0x133   :  { %144 = vst [vmem:[#allocation8] sm:$0x3] %v143_v42 }
 0x134   :  { %337 = shalt.err (!%p334_p0)
}
 0x135   :  { %s338_s25 = scalar_lea.hbm %s443_s3, 32 }
 0x136   :  { %p339_p1 = scmp.ne.s32.totalorder %s443_s3, %s338_s25  ;;  %p342_p2 = scmp.lt.u32.totalorder %s338_s25, %s443_s3 }
 0x138   :  { %p344_p3 = pnand %p342_p2, %p339_p1 }
 0x13a   :  { %347 = shalt.err (!%p344_p3)
}
 0x13b   :  { %164 = dma.vmem_to_hbm [thread:$0]  %s162_s22, 32, %s443_s3, [#allocation9]  }
 0x13c   :  { %352 = dma.done.wait [#allocation4], 128  }
 0x13d   :  { %353 = vsyncadd [#allocation4], 4294967168 }
 0x13e   :  { %354 = dma.done.wait [#allocation9], 32  }
 0x13f   :  { %355 = vsyncadd [#allocation9], 4294967264 }
 0x140   :  { %171 = vsyncpa [#allocation3], 1 }
 0x141   :  { %172 = vsyncpa [#allocation6], 1 }
 0x142   :  { %173 = vsyncpa [#allocation4], 1 }
 0x143   :  { %174 = vsyncpa [#allocation9], 1 }

</bundles_post_ra>
